<compile_context>
chip_gen: v7x
topology: tpu7x:2x2x1
jax: 0.10.0
libtpu: 0.0.40
codegen_flags: <defaults>
</compile_context>

<pallas_src>
import functools

import jax
import jax.numpy as jnp
from jax.experimental import pallas as pl
from jax.experimental.pallas import tpu as pltpu


def _round_up(x, m):
    return ((x + m - 1) // m) * m


def _vmem_capacity_bytes():
    """Physical VMEM of the local TPU generation (conservative fallback)."""
    try:
        info = pltpu.get_tpu_info()
        cap = int(getattr(info, "vmem_capacity_bytes", 0))
        if cap > 0:
            return cap
    except Exception:
        pass
    return 64 << 20  # v7x-sized conservative default


# -----------------------------------------------------------------------------
# Fast path: embedding table resident in VMEM; gather via in-VMEM dynamic
# row indexing.  No scratch, no DMAs, grid axis fully parallel.
# -----------------------------------------------------------------------------
def _resident_kernel(tb, unroll,
                     nid_ref, nbr_ref,           # scalar prefetch (SMEM, int32)
                     table_ref, bias_ref,        # VMEM: full (n_node, D) table, (1, tb) bias
                     u_ref, v_ref, prob_ref):    # outputs: (tb, D), (tb, D), (1, tb)
    b = pl.program_id(0)
    base = pl.multiple_of(b * tb, tb)

    @pl.loop(0, tb // unroll)
    def _(step):
        r0 = pl.multiple_of(step * unroll, unroll)
        for k in range(unroll):               # static unroll: overlap SMEM index
            r = r0 + k                        # loads with the gather loads/stores
            i = nid_ref[base + r]
            j = nbr_ref[base + r]
            u_ref[pl.ds(r, 1), :] = table_ref[pl.ds(i, 1), :]
            v_ref[pl.ds(r, 1), :] = table_ref[pl.ds(j, 1), :]

    u = u_ref[...].astype(jnp.float32)
    v = v_ref[...].astype(jnp.float32)
    score = jnp.sum(u * v, axis=1).reshape(1, tb) + bias_ref[...]   # VPU mul + XLU reduce
    prob = jnp.clip(jax.nn.sigmoid(score), 1e-5, 1.0)               # EUP sigmoid
    prob_ref[...] = prob.astype(prob_ref.dtype)


# -----------------------------------------------------------------------------
# Fallback path: table stays in HBM; double-buffered per-row gather DMAs with
# one shared semaphore per slot and a single fat wait per block.
# -----------------------------------------------------------------------------
def _hbm_gather_kernel(tb, unroll,
                       nid_ref, nbr_ref,          # scalar prefetch (SMEM, int32)
                       emb_hbm, bias_ref,         # HBM table, (1, tb) bias
                       u_ref, v_ref, prob_ref,    # outputs: (tb, D), (tb, D), (1, tb)
                       uv_buf, sem):              # scratch: VMEM (2,2,tb,D), DMA sem (2,)
    b = pl.program_id(0)
    nb = pl.num_programs(0)
    slot = b & 1

    def fetch_block(block_idx, slot_idx):
        base = block_idx * tb

        @pl.loop(0, tb // unroll)
        def _(step):
            r0 = pl.multiple_of(step * unroll, unroll)
            for k in range(unroll):           # static unroll keeps the single
                r = r0 + k                    # vector-misc descriptor slot busy
                row = base + r
                pltpu.make_async_copy(emb_hbm.at[nid_ref[row]],
                                      uv_buf.at[slot_idx, 0, r],
                                      sem.at[slot_idx]).start()
                pltpu.make_async_copy(emb_hbm.at[nbr_ref[row]],
                                      uv_buf.at[slot_idx, 1, r],
                                      sem.at[slot_idx]).start()

    # Prime the pipeline: the first grid step fetches its own block.
    @pl.when(b == 0)
    def _():
        fetch_block(0, 0)

    # Prefetch next block's gathers so the DMA queue never drains.
    @pl.when(b + 1 < nb)
    def _():
        fetch_block(b + 1, (b + 1) & 1)

    # ONE fat wait per block: the DMA semaphore accumulates the bytes of all
    # 2*tb row copies into this slot, so a single descriptor covering the
    # whole (2, tb, D) slot slab waits for exactly that amount.
    buf = uv_buf.at[slot]
    pltpu.make_async_copy(buf, buf, sem.at[slot]).wait()

    u = buf[0]                                 # (tb, D)
    v = buf[1]                                 # (tb, D)
    u_ref[...] = u
    v_ref[...] = v

    uf = u.astype(jnp.float32)
    vf = v.astype(jnp.float32)
    score = jnp.sum(uf * vf, axis=1).reshape(1, tb) + bias_ref[...]
    prob = jnp.clip(jax.nn.sigmoid(score), 1e-5, 1.0)
    prob_ref[...] = prob.astype(prob_ref.dtype)


def generator_forward(embedding_matrix, bias_vector, node_id, node_neighbor_id,
                      *, tb=None, unroll=8, force_hbm_gather=False):
    n_node, emb_dim = embedding_matrix.shape
    (batch,) = node_id.shape
    dtype = embedding_matrix.dtype
    dsize = jnp.dtype(dtype).itemsize

    vmem_cap = _vmem_capacity_bytes()
    table_bytes = n_node * emb_dim * dsize
    # Resident-table threshold: (possibly double-buffered) table + per-block
    # I/O + headroom must fit this generation's physical VMEM
    # (64 MiB on v7x, 128 MiB on v5e/v6e).
    use_resident = (not force_hbm_gather) and (3 * table_bytes + (8 << 20) <= vmem_cap)

    # Batch-block size: big blocks amortize the ~0.35 us per-grid-step overhead
    # and keep prob/bias blocks lane-dense (multiple of 128) for multi-block grids.
    if tb is None:
        cap_tb = 1024 if use_resident else 256
        if batch >= cap_tb:
            tb = cap_tb
        elif batch >= 128:
            tb = _round_up(batch, 128)
        else:
            tb = _round_up(max(batch, 1), 8)
    tb = _round_up(tb, max(8, unroll))
    nb = pl.cdiv(batch, tb)
    padded = nb * tb

    # Padded rows gather embedding row 0 (requires n_node >= 1) and are sliced
    # off in the wrapper.
    nid = jnp.pad(node_id.astype(jnp.int32), (0, padded - batch))
    nbr = jnp.pad(node_neighbor_id.astype(jnp.int32), (0, padded - batch))

    # Batch-sized bias gather stays in the wrapper: lane-dense (1, tb) blocks,
    # no full (n_node,) vector shipped into SMEM.
    bias_g = bias_vector.astype(jnp.float32)[nbr].reshape(nb, tb)

    out_shape = (
        jax.ShapeDtypeStruct((padded, emb_dim), dtype),   # node_embedding
        jax.ShapeDtypeStruct((padded, emb_dim), dtype),   # node_neighbor_embedding
        jax.ShapeDtypeStruct((nb, tb), jnp.float32),      # prob blocks (lane-dense rows)
    )
    out_specs = [
        pl.BlockSpec((tb, emb_dim), lambda b, nid, nbr: (b, 0)),
        pl.BlockSpec((tb, emb_dim), lambda b, nid, nbr: (b, 0)),
        pl.BlockSpec((1, tb), lambda b, nid, nbr: (b, 0)),
    ]
    bias_spec = pl.BlockSpec((1, tb), lambda b, nid, nbr: (b, 0))

    if use_resident:
        grid_spec = pltpu.PrefetchScalarGridSpec(
            num_scalar_prefetch=2,
            grid=(nb,),
            in_specs=[
                # Whole table resident in VMEM (constant block index -> fetched once).
                pl.BlockSpec((n_node, emb_dim), lambda b, nid, nbr: (0, 0)),
                bias_spec,
            ],
            out_specs=out_specs,
        )
        kernel = functools.partial(_resident_kernel, tb, unroll)
        # No cross-step state: parallel grid => both v7x TensorCores run.
        dims = ("parallel",)
    else:
        grid_spec = pltpu.PrefetchScalarGridSpec(
            num_scalar_prefetch=2,
            grid=(nb,),
            in_specs=[
                pl.BlockSpec(memory_space=pl.ANY),   # table stays in HBM
                bias_spec,
            ],
            out_specs=out_specs,
            scratch_shapes=[
                pltpu.VMEM((2, 2, tb, emb_dim), dtype),   # double-buffered {u,v} gathers
                pltpu.SemaphoreType.DMA((2,)),            # one sem per slot (u+v combined)
            ],
        )
        kernel = functools.partial(_hbm_gather_kernel, tb, unroll)
        # Cross-step double-buffered prefetch requires sequential grid steps.
        # TODO(synk): shard the batch over v7x's two TensorCores at the wrapper
        # level (two pallas_call shards) for this HBM-gather path.
        dims = ("arbitrary",)

    cp_kwargs = dict(dimension_semantics=dims)
    if use_resident:
        # Only raise the scoped-VMEM limit when the resident table needs it;
        # stay within the generation's physical capacity.
        need = 3 * table_bytes + 4 * (2 * tb * emb_dim * dsize + 8 * tb) + (2 << 20)
        if need > (16 << 20):
            cp_kwargs["vmem_limit_bytes"] = int(min(need, vmem_cap - (2 << 20)))

    u_pad, v_pad, prob_blocks = pl.pallas_call(
        kernel,
        grid_spec=grid_spec,
        out_shape=out_shape,
        compiler_params=pltpu.CompilerParams(**cp_kwargs),
    )(nid, nbr, embedding_matrix, bias_g)

    node_embedding = u_pad[:batch]
    node_neighbor_embedding = v_pad[:batch]
    prob = prob_blocks.reshape(padded)[:batch]
    return node_embedding, node_neighbor_embedding, prob


def _reference(embedding_matrix, bias_vector, node_id, node_neighbor_id):
    u = embedding_matrix[node_id]
    v = embedding_matrix[node_neighbor_id]
    score = jnp.sum(u * v, axis=1) + bias_vector[node_neighbor_id]
    prob = jnp.clip(jax.nn.sigmoid(score), 1e-5, 1.0)
    return u, v, prob


if __name__ == "__main__":
    key = jax.random.PRNGKey(0)
    n_node, emb_dim = 64, 32
    k1, k2 = jax.random.split(key, 2)

    # Deterministic parameter init mirroring reset_parameters():
    #   embedding_matrix <- node_emd_init ; bias_vector <- zeros
    node_emd_init = 0.1 * jax.random.normal(k1, (n_node, emb_dim), dtype=jnp.float32)
    embedding_matrix = node_emd_init
    bias_zero = jnp.zeros((n_node,), dtype=jnp.float32)
    # Trained bias would be nonzero; exercise that path too.
    bias_rand = 0.05 * jax.random.normal(k2, (n_node,), dtype=jnp.float32)

    cases = (
        # fast path, single block
        (16, bias_zero, {}),
        # fast path, multi-block grid + padding
        (300, bias_rand, {"tb": 128}),
        # HBM-gather fallback, multi-block grid + padding
        (300, bias_rand, {"tb": 128, "force_hbm_gather": True}),
    )

    ok = True
    for batch, bias_vector, kwargs in cases:
        kk1, kk2 = jax.random.split(jax.random.fold_in(key, batch))
        node_id = jax.random.randint(kk1, (batch,), 0, n_node, dtype=jnp.int32)
        node_neighbor_id = jax.random.randint(kk2, (batch,), 0, n_node, dtype=jnp.int32)

        out_u, out_v, prob = generator_forward(
            embedding_matrix, bias_vector, node_id, node_neighbor_id, **kwargs)
        jax.block_until_ready((out_u, out_v, prob))

        ref_u, ref_v, ref_prob = _reference(
            embedding_matrix, bias_vector, node_id, node_neighbor_id)

        assert out_u.shape == (batch, emb_dim) and out_v.shape == (batch, emb_dim)
        assert prob.shape == (batch,)
        ok &= bool(jnp.allclose(out_u, ref_u))
        ok &= bool(jnp.allclose(out_v, ref_v))
        ok &= bool(jnp.allclose(prob, ref_prob, atol=1e-6))

    assert ok
    print("KERNEL_OK")
</pallas_src>

<mosaic_0001>
module attributes {stable_mosaic.version = 11 : i64} {
  func.func @_resident_kernel(%arg0: i32, %arg1: memref<16xi32, #tpu.memory_space<smem>>, %arg2: memref<16xi32, #tpu.memory_space<smem>>, %arg3: memref<64x32xf32, #tpu.memory_space<vmem>>, %arg4: memref<1x16xf32, #tpu.memory_space<vmem>>, %arg5: memref<16x32xf32, #tpu.memory_space<vmem>>, %arg6: memref<16x32xf32, #tpu.memory_space<vmem>>, %arg7: memref<1x16xf32, #tpu.memory_space<vmem>>) attributes {dimension_semantics = [#tpu.dimension_semantics<parallel>], iteration_bounds = array<i64: 1>, scalar_prefetch = 2 : i64, scratch_operands = 0 : i64, tpu.core_type = #tpu.core_type<tc>, window_params = [{pipeline_mode = #tpu.pipeline_mode<synchronous>, transform_indices = @transform_0, window_bounds = array<i64: 64, 32>}, {transform_indices = @transform_1, window_bounds = array<i64: 1, 16>}, {transform_indices = @transform_2, window_bounds = array<i64: 16, 32>}, {transform_indices = @transform_3, window_bounds = array<i64: 16, 32>}, {transform_indices = @transform_4, window_bounds = array<i64: 1, 16>}]} {
    %c16_i32 = arith.constant 16 : i32
    %0 = arith.muli %arg0, %c16_i32 : i32
    %1 = tpu.assume_multiple %0, 16 : i32
    %c0_i32 = arith.constant 0 : i32
    %c2_i32 = arith.constant 2 : i32
    %2 = arith.addi %c0_i32, %c2_i32 : i32
    %c1_i32 = arith.constant 1 : i32
    scf.for %arg8 = %c0_i32 to %2 step %c1_i32  : i32 {
      %c1_i32_11 = arith.constant 1 : i32
      %20 = arith.muli %arg8, %c1_i32_11 : i32
      %c0_i32_12 = arith.constant 0 : i32
      %21 = arith.addi %c0_i32_12, %20 : i32
      %c8_i32 = arith.constant 8 : i32
      %22 = arith.muli %21, %c8_i32 : i32
      %23 = tpu.assume_multiple %22, 8 : i32
      %c0_i32_13 = arith.constant 0 : i32
      %24 = arith.addi %23, %c0_i32_13 : i32
      %25 = arith.addi %1, %24 : i32
      %26 = arith.index_cast %25 : i32 to index
      %27 = memref.load %arg1[%26] : memref<16xi32, #tpu.memory_space<smem>>
      %28 = arith.addi %1, %24 : i32
      %29 = arith.index_cast %28 : i32 to index
      %30 = memref.load %arg2[%29] : memref<16xi32, #tpu.memory_space<smem>>
      %31 = arith.index_cast %27 : i32 to index
      %c0_14 = arith.constant 0 : index
      %32 = vector.load %arg3[%31, %c0_14] : memref<64x32xf32, #tpu.memory_space<vmem>>, vector<1x32xf32>
      %33 = arith.index_cast %24 : i32 to index
      %c0_15 = arith.constant 0 : index
      %34 = vector.load %arg5[%33, %c0_15] : memref<16x32xf32, #tpu.memory_space<vmem>>, vector<1x32xf32>
      tpu.vector_store %arg5[%33, %c0_15], %32 {strides = array<i32>} : memref<16x32xf32, #tpu.memory_space<vmem>>, vector<1x32xf32>,
      %35 = arith.index_cast %30 : i32 to index
      %c0_16 = arith.constant 0 : index
      %36 = vector.load %arg3[%35, %c0_16] : memref<64x32xf32, #tpu.memory_space<vmem>>, vector<1x32xf32>
      %37 = arith.index_cast %24 : i32 to index
      %c0_17 = arith.constant 0 : index
      %38 = vector.load %arg6[%37, %c0_17] : memref<16x32xf32, #tpu.memory_space<vmem>>, vector<1x32xf32>
      tpu.vector_store %arg6[%37, %c0_17], %36 {strides = array<i32>} : memref<16x32xf32, #tpu.memory_space<vmem>>, vector<1x32xf32>,
      %c1_i32_18 = arith.constant 1 : i32
      %39 = arith.addi %23, %c1_i32_18 : i32
      %40 = arith.addi %1, %39 : i32
      %41 = arith.index_cast %40 : i32 to index
      %42 = memref.load %arg1[%41] : memref<16xi32, #tpu.memory_space<smem>>
      %43 = arith.addi %1, %39 : i32
      %44 = arith.index_cast %43 : i32 to index
      %45 = memref.load %arg2[%44] : memref<16xi32, #tpu.memory_space<smem>>
      %46 = arith.index_cast %42 : i32 to index
      %c0_19 = arith.constant 0 : index
      %47 = vector.load %arg3[%46, %c0_19] : memref<64x32xf32, #tpu.memory_space<vmem>>, vector<1x32xf32>
      %48 = arith.index_cast %39 : i32 to index
      %c0_20 = arith.constant 0 : index
      %49 = vector.load %arg5[%48, %c0_20] : memref<16x32xf32, #tpu.memory_space<vmem>>, vector<1x32xf32>
      tpu.vector_store %arg5[%48, %c0_20], %47 {strides = array<i32>} : memref<16x32xf32, #tpu.memory_space<vmem>>, vector<1x32xf32>,
      %50 = arith.index_cast %45 : i32 to index
      %c0_21 = arith.constant 0 : index
      %51 = vector.load %arg3[%50, %c0_21] : memref<64x32xf32, #tpu.memory_space<vmem>>, vector<1x32xf32>
      %52 = arith.index_cast %39 : i32 to index
      %c0_22 = arith.constant 0 : index
      %53 = vector.load %arg6[%52, %c0_22] : memref<16x32xf32, #tpu.memory_space<vmem>>, vector<1x32xf32>
      tpu.vector_store %arg6[%52, %c0_22], %51 {strides = array<i32>} : memref<16x32xf32, #tpu.memory_space<vmem>>, vector<1x32xf32>,
      %c2_i32_23 = arith.constant 2 : i32
      %54 = arith.addi %23, %c2_i32_23 : i32
      %55 = arith.addi %1, %54 : i32
      %56 = arith.index_cast %55 : i32 to index
      %57 = memref.load %arg1[%56] : memref<16xi32, #tpu.memory_space<smem>>
      %58 = arith.addi %1, %54 : i32
      %59 = arith.index_cast %58 : i32 to index
      %60 = memref.load %arg2[%59] : memref<16xi32, #tpu.memory_space<smem>>
      %61 = arith.index_cast %57 : i32 to index
      %c0_24 = arith.constant 0 : index
      %62 = vector.load %arg3[%61, %c0_24] : memref<64x32xf32, #tpu.memory_space<vmem>>, vector<1x32xf32>
      %63 = arith.index_cast %54 : i32 to index
      %c0_25 = arith.constant 0 : index
      %64 = vector.load %arg5[%63, %c0_25] : memref<16x32xf32, #tpu.memory_space<vmem>>, vector<1x32xf32>
      tpu.vector_store %arg5[%63, %c0_25], %62 {strides = array<i32>} : memref<16x32xf32, #tpu.memory_space<vmem>>, vector<1x32xf32>,
      %65 = arith.index_cast %60 : i32 to index
      %c0_26 = arith.constant 0 : index
      %66 = vector.load %arg3[%65, %c0_26] : memref<64x32xf32, #tpu.memory_space<vmem>>, vector<1x32xf32>
      %67 = arith.index_cast %54 : i32 to index
      %c0_27 = arith.constant 0 : index
      %68 = vector.load %arg6[%67, %c0_27] : memref<16x32xf32, #tpu.memory_space<vmem>>, vector<1x32xf32>
      tpu.vector_store %arg6[%67, %c0_27], %66 {strides = array<i32>} : memref<16x32xf32, #tpu.memory_space<vmem>>, vector<1x32xf32>,
      %c3_i32 = arith.constant 3 : i32
      %69 = arith.addi %23, %c3_i32 : i32
      %70 = arith.addi %1, %69 : i32
      %71 = arith.index_cast %70 : i32 to index
      %72 = memref.load %arg1[%71] : memref<16xi32, #tpu.memory_space<smem>>
      %73 = arith.addi %1, %69 : i32
      %74 = arith.index_cast %73 : i32 to index
      %75 = memref.load %arg2[%74] : memref<16xi32, #tpu.memory_space<smem>>
      %76 = arith.index_cast %72 : i32 to index
      %c0_28 = arith.constant 0 : index
      %77 = vector.load %arg3[%76, %c0_28] : memref<64x32xf32, #tpu.memory_space<vmem>>, vector<1x32xf32>
      %78 = arith.index_cast %69 : i32 to index
      %c0_29 = arith.constant 0 : index
      %79 = vector.load %arg5[%78, %c0_29] : memref<16x32xf32, #tpu.memory_space<vmem>>, vector<1x32xf32>
      tpu.vector_store %arg5[%78, %c0_29], %77 {strides = array<i32>} : memref<16x32xf32, #tpu.memory_space<vmem>>, vector<1x32xf32>,
      %80 = arith.index_cast %75 : i32 to index
      %c0_30 = arith.constant 0 : index
      %81 = vector.load %arg3[%80, %c0_30] : memref<64x32xf32, #tpu.memory_space<vmem>>, vector<1x32xf32>
      %82 = arith.index_cast %69 : i32 to index
      %c0_31 = arith.constant 0 : index
      %83 = vector.load %arg6[%82, %c0_31] : memref<16x32xf32, #tpu.memory_space<vmem>>, vector<1x32xf32>
      tpu.vector_store %arg6[%82, %c0_31], %81 {strides = array<i32>} : memref<16x32xf32, #tpu.memory_space<vmem>>, vector<1x32xf32>,
      %c4_i32 = arith.constant 4 : i32
      %84 = arith.addi %23, %c4_i32 : i32
      %85 = arith.addi %1, %84 : i32
      %86 = arith.index_cast %85 : i32 to index
      %87 = memref.load %arg1[%86] : memref<16xi32, #tpu.memory_space<smem>>
      %88 = arith.addi %1, %84 : i32
      %89 = arith.index_cast %88 : i32 to index
      %90 = memref.load %arg2[%89] : memref<16xi32, #tpu.memory_space<smem>>
      %91 = arith.index_cast %87 : i32 to index
      %c0_32 = arith.constant 0 : index
      %92 = vector.load %arg3[%91, %c0_32] : memref<64x32xf32, #tpu.memory_space<vmem>>, vector<1x32xf32>
      %93 = arith.index_cast %84 : i32 to index
      %c0_33 = arith.constant 0 : index
      %94 = vector.load %arg5[%93, %c0_33] : memref<16x32xf32, #tpu.memory_space<vmem>>, vector<1x32xf32>
      tpu.vector_store %arg5[%93, %c0_33], %92 {strides = array<i32>} : memref<16x32xf32, #tpu.memory_space<vmem>>, vector<1x32xf32>,
      %95 = arith.index_cast %90 : i32 to index
      %c0_34 = arith.constant 0 : index
      %96 = vector.load %arg3[%95, %c0_34] : memref<64x32xf32, #tpu.memory_space<vmem>>, vector<1x32xf32>
      %97 = arith.index_cast %84 : i32 to index
      %c0_35 = arith.constant 0 : index
      %98 = vector.load %arg6[%97, %c0_35] : memref<16x32xf32, #tpu.memory_space<vmem>>, vector<1x32xf32>
      tpu.vector_store %arg6[%97, %c0_35], %96 {strides = array<i32>} : memref<16x32xf32, #tpu.memory_space<vmem>>, vector<1x32xf32>,
      %c5_i32 = arith.constant 5 : i32
      %99 = arith.addi %23, %c5_i32 : i32
      %100 = arith.addi %1, %99 : i32
      %101 = arith.index_cast %100 : i32 to index
      %102 = memref.load %arg1[%101] : memref<16xi32, #tpu.memory_space<smem>>
      %103 = arith.addi %1, %99 : i32
      %104 = arith.index_cast %103 : i32 to index
      %105 = memref.load %arg2[%104] : memref<16xi32, #tpu.memory_space<smem>>
      %106 = arith.index_cast %102 : i32 to index
      %c0_36 = arith.constant 0 : index
      %107 = vector.load %arg3[%106, %c0_36] : memref<64x32xf32, #tpu.memory_space<vmem>>, vector<1x32xf32>
      %108 = arith.index_cast %99 : i32 to index
      %c0_37 = arith.constant 0 : index
      %109 = vector.load %arg5[%108, %c0_37] : memref<16x32xf32, #tpu.memory_space<vmem>>, vector<1x32xf32>
      tpu.vector_store %arg5[%108, %c0_37], %107 {strides = array<i32>} : memref<16x32xf32, #tpu.memory_space<vmem>>, vector<1x32xf32>,
      %110 = arith.index_cast %105 : i32 to index
      %c0_38 = arith.constant 0 : index
      %111 = vector.load %arg3[%110, %c0_38] : memref<64x32xf32, #tpu.memory_space<vmem>>, vector<1x32xf32>
      %112 = arith.index_cast %99 : i32 to index
      %c0_39 = arith.constant 0 : index
      %113 = vector.load %arg6[%112, %c0_39] : memref<16x32xf32, #tpu.memory_space<vmem>>, vector<1x32xf32>
      tpu.vector_store %arg6[%112, %c0_39], %111 {strides = array<i32>} : memref<16x32xf32, #tpu.memory_space<vmem>>, vector<1x32xf32>,
      %c6_i32 = arith.constant 6 : i32
      %114 = arith.addi %23, %c6_i32 : i32
      %115 = arith.addi %1, %114 : i32
      %116 = arith.index_cast %115 : i32 to index
      %117 = memref.load %arg1[%116] : memref<16xi32, #tpu.memory_space<smem>>
      %118 = arith.addi %1, %114 : i32
      %119 = arith.index_cast %118 : i32 to index
      %120 = memref.load %arg2[%119] : memref<16xi32, #tpu.memory_space<smem>>
      %121 = arith.index_cast %117 : i32 to index
      %c0_40 = arith.constant 0 : index
      %122 = vector.load %arg3[%121, %c0_40] : memref<64x32xf32, #tpu.memory_space<vmem>>, vector<1x32xf32>
      %123 = arith.index_cast %114 : i32 to index
      %c0_41 = arith.constant 0 : index
      %124 = vector.load %arg5[%123, %c0_41] : memref<16x32xf32, #tpu.memory_space<vmem>>, vector<1x32xf32>
      tpu.vector_store %arg5[%123, %c0_41], %122 {strides = array<i32>} : memref<16x32xf32, #tpu.memory_space<vmem>>, vector<1x32xf32>,
      %125 = arith.index_cast %120 : i32 to index
      %c0_42 = arith.constant 0 : index
      %126 = vector.load %arg3[%125, %c0_42] : memref<64x32xf32, #tpu.memory_space<vmem>>, vector<1x32xf32>
      %127 = arith.index_cast %114 : i32 to index
      %c0_43 = arith.constant 0 : index
      %128 = vector.load %arg6[%127, %c0_43] : memref<16x32xf32, #tpu.memory_space<vmem>>, vector<1x32xf32>
      tpu.vector_store %arg6[%127, %c0_43], %126 {strides = array<i32>} : memref<16x32xf32, #tpu.memory_space<vmem>>, vector<1x32xf32>,
      %c7_i32 = arith.constant 7 : i32
      %129 = arith.addi %23, %c7_i32 : i32
      %130 = arith.addi %1, %129 : i32
      %131 = arith.index_cast %130 : i32 to index
      %132 = memref.load %arg1[%131] : memref<16xi32, #tpu.memory_space<smem>>
      %133 = arith.addi %1, %129 : i32
      %134 = arith.index_cast %133 : i32 to index
      %135 = memref.load %arg2[%134] : memref<16xi32, #tpu.memory_space<smem>>
      %136 = arith.index_cast %132 : i32 to index
      %c0_44 = arith.constant 0 : index
      %137 = vector.load %arg3[%136, %c0_44] : memref<64x32xf32, #tpu.memory_space<vmem>>, vector<1x32xf32>
      %138 = arith.index_cast %129 : i32 to index
      %c0_45 = arith.constant 0 : index
      %139 = vector.load %arg5[%138, %c0_45] : memref<16x32xf32, #tpu.memory_space<vmem>>, vector<1x32xf32>
      tpu.vector_store %arg5[%138, %c0_45], %137 {strides = array<i32>} : memref<16x32xf32, #tpu.memory_space<vmem>>, vector<1x32xf32>,
      %140 = arith.index_cast %135 : i32 to index
      %c0_46 = arith.constant 0 : index
      %141 = vector.load %arg3[%140, %c0_46] : memref<64x32xf32, #tpu.memory_space<vmem>>, vector<1x32xf32>
      %142 = arith.index_cast %129 : i32 to index
      %c0_47 = arith.constant 0 : index
      %143 = vector.load %arg6[%142, %c0_47] : memref<16x32xf32, #tpu.memory_space<vmem>>, vector<1x32xf32>
      tpu.vector_store %arg6[%142, %c0_47], %141 {strides = array<i32>} : memref<16x32xf32, #tpu.memory_space<vmem>>, vector<1x32xf32>,
    }
    %c2_i32_0 = arith.constant 2 : i32
    %c0 = arith.constant 0 : index
    %c0_1 = arith.constant 0 : index
    %3 = vector.load %arg5[%c0, %c0_1] : memref<16x32xf32, #tpu.memory_space<vmem>>, vector<16x32xf32>
    %c0_2 = arith.constant 0 : index
    %c0_3 = arith.constant 0 : index
    %4 = vector.load %arg6[%c0_2, %c0_3] : memref<16x32xf32, #tpu.memory_space<vmem>>, vector<16x32xf32>
    %5 = arith.mulf %3, %4 : vector<16x32xf32>
    %cst = arith.constant dense<0.000000e+00> : vector<16xf32>
    %6 = vector.multi_reduction <add>, %5, %cst [1] : vector<16x32xf32> to vector<16xf32>
    %7 = vector.shape_cast %6 : vector<16xf32> to vector<1x16xf32>
    %c0_4 = arith.constant 0 : index
    %c0_5 = arith.constant 0 : index
    %8 = vector.load %arg4[%c0_4, %c0_5] : memref<1x16xf32, #tpu.memory_space<vmem>>, vector<1x16xf32>
    %9 = arith.addf %7, %8 : vector<1x16xf32>
    %10 = arith.negf %9 : vector<1x16xf32>
    %11 = math.exp %10 : vector<1x16xf32>
    %cst_6 = arith.constant 1.000000e+00 : f32
    %12 = vector.broadcast %cst_6 : f32 to vector<1x16xf32>
    %13 = arith.addf %12, %11 : vector<1x16xf32>
    %14 = arith.divf %12, %13 : vector<1x16xf32>
    %cst_7 = arith.constant 9.99999974E-6 : f32
    %cst_8 = arith.constant 1.000000e+00 : f32
    %15 = vector.broadcast %cst_7 : f32 to vector<1x16xf32>
    %16 = arith.maximumf %15, %14 : vector<1x16xf32>
    %17 = vector.broadcast %cst_8 : f32 to vector<1x16xf32>
    %18 = arith.minimumf %17, %16 : vector<1x16xf32>
    %c0_9 = arith.constant 0 : index
    %c0_10 = arith.constant 0 : index
    %19 = vector.load %arg7[%c0_9, %c0_10] : memref<1x16xf32, #tpu.memory_space<vmem>>, vector<1x16xf32>
    tpu.vector_store %arg7[%c0_9, %c0_10], %18 {strides = array<i32>} : memref<1x16xf32, #tpu.memory_space<vmem>>, vector<1x16xf32>,
    return
  }
  func.func @transform_0(%arg0: i32, %arg1: memref<16xi32, #tpu.memory_space<smem>>, %arg2: memref<16xi32, #tpu.memory_space<smem>>) -> (i32, i32) {
    %c0_i32 = arith.constant 0 : i32
    %c0_i32_0 = arith.constant 0 : i32
    %c0_i32_1 = arith.constant 0 : i32
    return %c0_i32, %c0_i32_0 : i32, i32
  }
  func.func @transform_1(%arg0: i32, %arg1: memref<16xi32, #tpu.memory_space<smem>>, %arg2: memref<16xi32, #tpu.memory_space<smem>>) -> (i32, i32) {
    %c0_i32 = arith.constant 0 : i32
    %c0_i32_0 = arith.constant 0 : i32
    return %arg0, %c0_i32 : i32, i32
  }
  func.func @transform_2(%arg0: i32, %arg1: memref<16xi32, #tpu.memory_space<smem>>, %arg2: memref<16xi32, #tpu.memory_space<smem>>) -> (i32, i32) {
    %c0_i32 = arith.constant 0 : i32
    %c0_i32_0 = arith.constant 0 : i32
    return %arg0, %c0_i32 : i32, i32
  }
  func.func @transform_3(%arg0: i32, %arg1: memref<16xi32, #tpu.memory_space<smem>>, %arg2: memref<16xi32, #tpu.memory_space<smem>>) -> (i32, i32) {
    %c0_i32 = arith.constant 0 : i32
    %c0_i32_0 = arith.constant 0 : i32
    return %arg0, %c0_i32 : i32, i32
  }
  func.func @transform_4(%arg0: i32, %arg1: memref<16xi32, #tpu.memory_space<smem>>, %arg2: memref<16xi32, #tpu.memory_space<smem>>) -> (i32, i32) {
    %c0_i32 = arith.constant 0 : i32
    %c0_i32_0 = arith.constant 0 : i32
    return %arg0, %c0_i32 : i32, i32
  }
}

</mosaic_0001>

<bundles_post_ra>
// kernel: tpu_custom_call.1
= control target key start
LH: loop header
LB: loop body
LE: loop exit
PB: predicated region body
PF: predicated region fallthrough
CT: control target
= control target key end

     0   :  { %s677_s0 = inlined_call_operand.vmem [shape: s32[16], index: 0, kind: input, shape index: {}]   ;;  %s678_s2 = inlined_call_operand.vmem [shape: f32[64,32], index: 2, kind: input, shape index: {}]   ;;  %s679_s3 = inlined_call_operand.vmem [shape: f32[1,16], index: 3, kind: input, shape index: {}]   ;;  %s680_s4 = inlined_call_operand.hbm [shape: f32[16,32], index: 4, kind: output, shape index: {0}]   ;;  %s681_s5 = inlined_call_operand.hbm [shape: f32[16,32], index: 5, kind: output, shape index: {1}]   ;;  %s682_s6 = inlined_call_operand.hbm [shape: f32[1,16], index: 6, kind: output, shape index: {2}]   ;;  %s683_s1 = inlined_call_operand.vmem [shape: s32[16], index: 1, kind: input, shape index: {}]  }
   0x1   :  { %s12_s23 = sshll.u32 %s677_s0, 4  ;;  %s16_s26 = sshll.u32 %s683_s1, 4  ;;  %s13_s23 = int_to_ptr.vmem [resolvable:$true] %s12_s23  ;;  %s17_s26 = int_to_ptr.vmem [resolvable:$true] %s16_s26 }
   0x2   :  { %s372_s27 = scalar_lea.vmem %s13_s23, 16  ;;  %p377_p1 = scmp.lt.s32.totalorder %s13_s23, %s13_s23 }
   0x3   :  { %p373_p0 = scmp.ne.s32.totalorder %s13_s23, %s372_s27  ;;  %p378_p2 = scmp.lt.s32.totalorder %s372_s27, %s372_s27 }
   0x5   :  { %p379_p3 = por %p378_p2, %p377_p1 }
   0x7   :  { %p380_p4 = pnand %p379_p3, %p373_p0 }
   0x9   :  { %383 = shalt.err (!%p380_p4)  }
   0xa   :  { %s476_s28 = smov [#allocation3]   ;;  %s384_s29 = scalar_lea.vmem %s17_s26, 16 }
   0xb   :  { %15 = dma.vmem_to_smem %s13_s23, 16, %s476_s28, [#allocation2] }
   0xc   :  { %p385_p5 = scmp.ne.s32.totalorder %s17_s26, %s384_s29  ;;  %p389_p6 = scmp.lt.s32.totalorder %s17_s26, %s17_s26 }
   0xd   :  { %p390_p7 = scmp.lt.s32.totalorder %s384_s29, %s384_s29 }
   0xf   :  { %p391_p8 = por %p390_p7, %p389_p6 }
  0x11   :  { %p392_p9 = pnand %p391_p8, %p385_p5 }
  0x13   :  { %395 = shalt.err (!%p392_p9)  }
  0x14   :  { %s477_s0 = smov [#allocation4]  }
  0x15   :  { %19 = dma.vmem_to_smem %s17_s26, 16, %s477_s0, [#allocation2] }
  0x16   :  { %466 = dma.done.wait [#allocation2], 32 }
  0x17   :  { %467 = vsyncadd [#allocation2], 4294967264 }
  0x18   :  { %21 = sfence }
  0x19   :  { %22 = vsyncpa [#allocation6], 0 }
  0x1a   :  { %23 = vsyncpa [#allocation8], 0  ;;  %s525_s1 = smov 0  }
  0x1b LB: > { %s531_s30 = sshll.u32 %s474_s1, 3  ;;  %vm42_vm0 = vcmask 253952   ;;  %s34_s1 = sadd.s32 1, %s474_s1   ;;  %s474_s1 = sphi %s525_s1, %s34_s1  }
  0x1c   : > { %s37_s7 = sld [smem:[#allocation3 + %s531_s30]]  ;;  %s48_s9 = sadd.s32 1, %s531_s30 }
  0x1d   : > { %s38_s8 = sld [smem:[#allocation4 + %s531_s30]]  ;;  %s60_s10 = sadd.s32 2, %s531_s30 }
  0x1e   : > { %s50_s11 = sld [smem:[#allocation3 + %s48_s9]]  ;;  %s72_s15 = sadd.s32 3, %s531_s30 }
  0x1f   : > { %s51_s12 = sld [smem:[#allocation4 + %s48_s9]]  ;;  %s84_s16 = sadd.s32 4, %s531_s30 }
  0x20   : > { %s62_s13 = sld [smem:[#allocation3 + %s60_s10]]  ;;  %s546_s25 = scalar_lea.vmem [#allocation5], %s531_s30 }
  0x21   : > { %s63_s14 = sld [smem:[#allocation4 + %s60_s10]]  ;;  %s551_s28 = scalar_lea.vmem [#allocation7], %s531_s30 }
  0x22   : > { %s39_s19 = scalar_lea.vmem %s678_s2, %s37_s7  ;;  %s74_s20 = sld [smem:[#allocation3 + %s72_s15]] }
  0x23   : > { %v40_v0 = vld [vmem:[%s39_s19] sm:$0x1]  ;;  %s44_s23 = scalar_lea.vmem %s678_s2, %s38_s8  ;;  %s75_s24 = sld [smem:[#allocation4 + %s72_s15]] }
  0x24   : > { %43 = vst.msk [vmem:[%s546_s25] sm:$0x1] %vm42_vm0, %v40_v0  ;;  %v45_v1 = vld [vmem:[%s44_s23] sm:$0x1]  ;;  %s86_s26 = sld [smem:[#allocation3 + %s84_s16]]  ;;  %s52_s7 = scalar_lea.vmem %s678_s2, %s50_s11 }
  0x25   : > { %s87_s27 = sld [smem:[#allocation4 + %s84_s16]]  ;;  %47 = vst.msk [vmem:[%s551_s28] sm:$0x1] %vm42_vm0, %v45_v1  ;;  %s56_s10 = scalar_lea.vmem %s678_s2, %s51_s12  ;;  %v53_v2 = vld [vmem:[%s52_s7] sm:$0x1] }
  0x26   : > { %v57_v3 = vld [vmem:[%s56_s10] sm:$0x1]  ;;  %s64_s16 = scalar_lea.vmem %s678_s2, %s62_s13  ;;  %316 = vst.msk [vmem:[%s546_s25 + $0x1] sm:$0x1] %vm42_vm0, %v53_v2  ;;  %s96_s11 = sadd.s32 5, %s531_s30 }
  0x27   : > { %s68_s21 = scalar_lea.vmem %s678_s2, %s63_s14  ;;  %318 = vst.msk [vmem:[%s551_s28 + $0x1] sm:$0x1] %vm42_vm0, %v57_v3  ;;  %v65_v4 = vld [vmem:[%s64_s16] sm:$0x1]  ;;  %s108_s12 = sadd.s32 6, %s531_s30 }
  0x28   : > { %v69_v5 = vld [vmem:[%s68_s21] sm:$0x1]  ;;  %320 = vst.msk [vmem:[%s546_s25 + $0x2] sm:$0x1] %vm42_vm0, %v65_v4  ;;  %s76_s23 = scalar_lea.vmem %s678_s2, %s74_s20  ;;  %s98_s14 = sld [smem:[#allocation3 + %s96_s11]] }
  0x29   : > { %322 = vst.msk [vmem:[%s551_s28 + $0x2] sm:$0x1] %vm42_vm0, %v69_v5  ;;  %v77_v6 = vld [vmem:[%s76_s23] sm:$0x1]  ;;  %s80_s7 = scalar_lea.vmem %s678_s2, %s75_s24  ;;  %s99_s8 = sld [smem:[#allocation4 + %s96_s11]] }
  0x2a   : > { %324 = vst.msk [vmem:[%s546_s25 + $0x3] sm:$0x1] %vm42_vm0, %v77_v6  ;;  %v81_v7 = vld [vmem:[%s80_s7] sm:$0x1]  ;;  %s88_s15 = scalar_lea.vmem %s678_s2, %s86_s26  ;;  %s110_s18 = sld [smem:[#allocation3 + %s108_s12]] }
  0x2b   : > { %s92_s20 = scalar_lea.vmem %s678_s2, %s87_s27  ;;  %326 = vst.msk [vmem:[%s551_s28 + $0x3] sm:$0x1] %vm42_vm0, %v81_v7  ;;  %v89_v8 = vld [vmem:[%s88_s15] sm:$0x1]  ;;  %s111_s24 = sld [smem:[#allocation4 + %s108_s12]] }
  0x2c   : > { %v93_v9 = vld [vmem:[%s92_s20] sm:$0x1]  ;;  %328 = vst.msk [vmem:[%s546_s25 + $0x4] sm:$0x1] %vm42_vm0, %v89_v8  ;;  %s120_s19 = sadd.s32 7, %s531_s30  ;;  %p31_p10 = scmp.ge.s32.totalorder %s34_s1, 2  }
  0x2d   : > { %330 = vst.msk [vmem:[%s551_s28 + $0x4] sm:$0x1] %vm42_vm0, %v93_v9  ;;  %s122_s21 = sld [smem:[#allocation3 + %s120_s19]]  ;;  %vm138_vm1 = vcmask (%p31_p10), 261120   ;;  %v343_v21 = vld [vmem:[%s679_s3] ss:$0 sm:$0xff] (%p31_p10) }
  0x2e   : > { %s123_s26 = sld [smem:[#allocation4 + %s120_s19]]  ;;  %s100_s27 = scalar_lea.vmem %s678_s2, %s98_s14  ;;  %152 = vbcast.lane.b32.xlu1 (%p31_p10), %v343_v21, 256  ;;  %v478_v25 = vmov (%p31_p10), 0  }
  0x2f   : > { %v101_v10 = vld [vmem:[%s100_s27] sm:$0x1]  ;;  %s104_s12 = scalar_lea.vmem %s678_s2, %s99_s8  ;;  %362 = vset.pattern.permute.xlu0 (%p31_p10), %v478_v25  ;;  %363 = vset.pattern.permute.xlu1 (%p31_p10), %v478_v25  ;;  %s480_s1 = smov (%p31_p10), [#allocation5]  }
  0x30   : > { %332 = vst.msk [vmem:[%s546_s25 + $0x5] sm:$0x1] %vm42_vm0, %v101_v10  ;;  %v105_v11 = vld [vmem:[%s104_s12] sm:$0x1]  ;;  %s112_s0 = scalar_lea.vmem %s678_s2, %s110_s18  ;;  %33 = sbr.rel (!%p31_p10) target bundleno = 27 (0x1b), region = 83 }
  0x31   : > { %334 = vst.msk [vmem:[%s551_s28 + $0x5] sm:$0x1] %vm42_vm0, %v105_v11  ;;  %s116_s14 = scalar_lea.vmem %s678_s2, %s111_s24  ;;  %v113_v12 = vld [vmem:[%s112_s0] sm:$0x1] }
  0x32   : > { %v117_v13 = vld [vmem:[%s116_s14] sm:$0x1]  ;;  %336 = vst.msk [vmem:[%s546_s25 + $0x6] sm:$0x1] %vm42_vm0, %v113_v12  ;;  %156 = vbcast.lane.b32.xlu1 (%p31_p10), %v343_v21, 264 }
  0x33   : > { %338 = vst.msk [vmem:[%s551_s28 + $0x6] sm:$0x1] %vm42_vm0, %v117_v13  ;;  %s124_s15 = scalar_lea.vmem %s678_s2, %s122_s21 }
  0x34   : > { %s128_s20 = scalar_lea.vmem %s678_s2, %s123_s26  ;;  %v125_v14 = vld [vmem:[%s124_s15] sm:$0x1]  ;;  %s479_s2 = smov (%p31_p10), [#allocation7]  }
  0x35   : > { %v129_v15 = vld [vmem:[%s128_s20] sm:$0x1]  ;;  %340 = vst.msk [vmem:[%s546_s25 + $0x7] sm:$0x1] %vm42_vm0, %v125_v14  ;;  %s219_s3 = sshll.u32 (%p31_p10), %s479_s2, 4  ;;  %s207_s25 = sshll.u32 (%p31_p10), %s480_s1, 4  ;;  %s220_s3 = int_to_ptr.vmem [resolvable:$true] %s219_s3  ;;  %s634_s25 = int_to_ptr.vmem [resolvable:$true] %s207_s25 }
  0x36   : > { %342 = vst.msk [vmem:[%s551_s28 + $0x7] sm:$0x1] %vm42_vm0, %v129_v15  ;;  %s396_s28 = scalar_lea.vmem (%p31_p10), %s220_s3, 256  ;;  %p401_p12 = scmp.lt.s32.totalorder (%p31_p10), %s220_s3, %s220_s3 }
  0x37   :  { %p397_p11 = scmp.ne.s32.totalorder %s220_s3, %s396_s28  ;;  %p402_p13 = scmp.lt.s32.totalorder %s396_s28, %s396_s28 }
  0x39   :  { %p403_p0 = por %p402_p13, %p401_p12 }
  0x3b   :  { %p404_p1 = pnand %p403_p0, %p397_p11 }
  0x3c   :  { %v132_v16 = vld [vmem:[#allocation5] sm:$0xff]  ;;  %v133_v18 = vld [vmem:[#allocation5 + $0x8] sm:$0xff] }
  0x3d   :  { %v134_v17 = vld [vmem:[#allocation7] sm:$0xff]  ;;  %v135_v20 = vld [vmem:[#allocation7 + $0x8] sm:$0xff] }
  0x3e   :  { %v136_v19 = vmul.f32 %v134_v17, %v132_v16  ;;  %v137_v22 = vmul.f32 %v135_v20, %v133_v18 }
  0x40   :  { %v139_v23 = vsel %vm138_vm1, %v136_v19, 0.0  ;;  %v142_v24 = vsel %vm138_vm1, %v137_v22, 0.0 }
  0x41   :  { %140 = vadd.xlane.f32.xlu0 %v139_v23 }
  0x45   :  { %143 = vadd.xlane.f32.xlu0 %v142_v24 }
  0xa0   :  { %v153_v26 = vpop.permute.xlu1 %152 }
  0xa4   :  { %v157_v29 = vpop.permute.xlu1 %156 }
  0xce   :  { %v141_v27 = vpop.xlane.xlu0 %140 }
  0xcf   :  { %v160_v28 = vadd.f32 %v153_v26, %v141_v27 }
  0xd1   :  { %v344_v30 = vmul.f32 -1.442695, %v160_v28 }
  0xd2   :  { %v144_v31 = vpop.xlane.xlu0 %143 }
  0xd3   :  { %364 = vpow2.f32 %v344_v30  ;;  %v161_v32 = vadd.f32 %v157_v29, %v144_v31 }
  0xd5   :  { %v345_v33 = vmul.f32 -1.442695, %v161_v32 }
  0xd7   :  { %366 = vpow2.f32 %v345_v33 }
  0xdd   :  { %v365_v34 = vpop.eup %364 }
  0xde   :  { %v168_v35 = vadd.f32 1.0, %v365_v34 }
  0xe0   :  { %368 = vrcp.f32 %v168_v35 }
  0xe1   :  { %v367_v36 = vpop.eup %366 }
  0xe2   :  { %v169_v37 = vadd.f32 1.0, %v367_v36 }
  0xe4   :  { %370 = vrcp.f32 %v169_v37 }
  0xea   :  { %v369_v38 = vpop.eup %368 }
  0xeb   :  { %v174_v39 = vmax.f32 %v369_v38, 1e-05 }
  0xed   :  { %v176_v40 = vmin.f32 %v174_v39, 1.0 }
  0xee   :  { %v371_v41 = vpop.eup %370 }
  0xef   :  { %181 = vperm.xlu0 %362, %v176_v40   ;;  %v175_v42 = vmax.f32 %v371_v41, 1e-05 }
  0xf1   :  { %v177_v43 = vmin.f32 %v175_v42, 1.0 }
  0xf3   :  { %184 = vperm.xlu1 %363, %v177_v43  }
  0xf4   :  { %407 = shalt.err (!%p404_p1)
}
  0xf5   :  { %s408_s26 = scalar_lea.hbm %s681_s5, 256 }
  0xf6   :  { %p409_p2 = scmp.ne.s32.totalorder %s681_s5, %s408_s26  ;;  %p412_p3 = scmp.lt.u32.totalorder %s408_s26, %s681_s5 }
  0xf8   :  { %p414_p4 = pnand %p412_p3, %p409_p2 }
  0xfa   :  { %417 = shalt.err (!%p414_p4)
}
  0xfb   :  { %s481_s23 = smov 128   ;;  %s482_s12 = smov 8  }
  0xfc   :  { %225 = dma.vmem_to_hbm [thread:$0]  %s220_s3, 256, %s681_s5, [#allocation8], %s481_s23, %s481_s23, %s482_s12  }
  0xfd   :  { %s418_s0 = scalar_lea.vmem %s634_s25, 256  ;;  %p423_p6 = scmp.lt.s32.totalorder %s634_s25, %s634_s25 }
  0xfe   :  { %p419_p5 = scmp.ne.s32.totalorder %s634_s25, %s418_s0  ;;  %p424_p7 = scmp.lt.s32.totalorder %s418_s0, %s418_s0 }
 0x100   :  { %p425_p8 = por %p424_p7, %p423_p6 }
 0x102   :  { %p426_p9 = pnand %p425_p8, %p419_p5 }
 0x104   :  { %429 = shalt.err (!%p426_p9)
}
 0x105   :  { %s430_s14 = scalar_lea.hbm %s680_s4, 256 }
 0x106   :  { %p431_p10 = scmp.ne.s32.totalorder %s680_s4, %s430_s14  ;;  %p434_p11 = scmp.lt.u32.totalorder %s430_s14, %s680_s4 }
 0x108   :  { %p436_p12 = pnand %p434_p11, %p431_p10 }
 0x10a   :  { %439 = shalt.err (!%p436_p12)
}
 0x10b   :  { %213 = dma.vmem_to_hbm [thread:$0]  %s634_s25, 256, %s680_s4, [#allocation6], %s481_s23, %s481_s23, %s482_s12   ;;  %v186_v44 = vlaneseq  ;;  %vm197_vm2 = vcmask 130112   ;;  %vm200_vm3 = vcmask 122880  }
 0x10c   :  { %s483_s20 = smov [#allocation9]  }
 0x10d   :  { %v187_v45 = vand.u32 127, %v186_v44  ;;  %v189_v46 = vshrl.u32 %v186_v44, 7  ;;  %s232_s18 = sshll.u32 %s483_s20, 4  ;;  %s233_s18 = int_to_ptr.vmem [resolvable:$true] %s232_s18 }
 0x10e   :  { %s440_s24 = scalar_lea.vmem %s233_s18, 16  ;;  %s444_s4 = scalar_lea.vmem %s233_s18, 32 }
 0x10f   :  { %v192_v47 = vadd.s32 4294967288, %v187_v45  ;;  %v190_v48 = vsub.s32 %v187_v45, %v189_v46  ;;  %p441_p13 = scmp.ne.s32.totalorder %s233_s18, %s440_s24  ;;  %p445_p0 = scmp.lt.s32.totalorder %s233_s18, %s233_s18 }
 0x110   :  { %p446_p1 = scmp.lt.s32.totalorder %s444_s4, %s440_s24 }
 0x111   :  { %v195_v49 = vsub.s32 %v192_v47, %v189_v46 }
 0x112   :  { %p447_p2 = por %p446_p1, %p445_p0 }
 0x114   :  { %p448_p3 = pnand %p447_p2, %p441_p13 }
 0x16e   :  { %v182_v50 = vpop.permute.xlu0 %181 }
 0x16f   :  { %v191_v52 = vrot.slane %v182_v50, %v190_v48 }
 0x172   :  { %v185_v51 = vpop.permute.xlu1 %184 }
 0x173   :  { %v196_v53 = vrot.slane %v185_v51, %v195_v49 }
 0x175   :  { %v198_v54 = vsel %vm197_vm2, %v196_v53, %v191_v52 }
 0x176   :  { %201 = vst.msk [vmem:[#allocation9] sm:$0x1] %vm200_vm3, %v198_v54 }
 0x177   :  { %451 = shalt.err (!%p448_p3)
}
 0x178   :  { %s452_s1 = scalar_lea.hbm %s682_s6, 16 }
 0x179   :  { %p453_p4 = scmp.ne.s32.totalorder %s682_s6, %s452_s1  ;;  %p456_p5 = scmp.lt.u32.totalorder %s452_s1, %s682_s6 }
 0x17b   :  { %p458_p6 = pnand %p456_p5, %p453_p4 }
 0x17d   :  { %461 = shalt.err (!%p458_p6)
}
 0x17e   :  { %235 = dma.vmem_to_hbm [thread:$0]  %s233_s18, 16, %s682_s6, [#allocation8]  }
 0x17f   :  { %468 = dma.done.wait [#allocation6], 256  }
 0x180   :  { %469 = vsyncadd [#allocation6], 4294967040 }
 0x181   :  { %470 = dma.done.wait [#allocation8], 272  }
 0x182   :  { %471 = vsyncadd [#allocation8], 4294967024 }
 0x183   :  { %245 = vsyncpa [#allocation6], 1 }
 0x184   :  { %246 = vsyncpa [#allocation8], 1 }

</bundles_post_ra>
